<compile_context>
chip_gen: v7x
topology: tpu7x:2x2x1
jax: 0.10.0
libtpu: 0.0.40
codegen_flags: <defaults>
</compile_context>

<pallas_src>
import jax
import jax.numpy as jnp
from jax.experimental import pallas as pl
from jax.experimental.pallas import tpu as pltpu


def _round_up(v, m):
    return ((v + m - 1) // m) * m


def patch_embed_kernel(x_ref, w_ref, pos_ref, o_ref):
    # x_ref  : (1, TN, Kp)  bf16 patch features (global row 0 is the zero cls row)
    # w_ref  : (Kp, Ep)     bf16 flattened conv weight (resident across the grid)
    # pos_ref: (TN, Ep)     f32  pos rows (+conv bias; row 0 carries cls + pos[0])
    # o_ref  : (1, TN, Ep)  f32
    y = jnp.dot(x_ref[0], w_ref[...], preferred_element_type=jnp.float32)  # MXU, f32 acc
    o_ref[0] = (y + pos_ref[...]).astype(o_ref.dtype)                      # fused f32 add


def patch_embedding_forward(x, conv_w, conv_b, cls_token, pos_embed, patch_size, *, tn=None):
    """Equivalent of PatchEmbedding.forward.

    x:         (B, C, H, W)  NCHW, like PyTorch
    conv_w:    (E, C, P, P)  Conv2d weight
    conv_b:    (E,)          Conv2d bias
    cls_token: (1, 1, E)
    pos_embed: (N+1, E)
    returns:   (B, N+1, E) float32
    """
    B, C, H, W = x.shape
    P = patch_size
    E = conv_w.shape[0]
    nH, nW = H // P, W // P
    N = nH * nW
    T = N + 1                         # tokens incl. cls
    K = C * P * P

    # Lane-dense stores / weight: pad E up to a multiple of 128 (no-op for real
    # ViT sizes where E % 128 == 0; toy sizes pay a small slice at the end).
    Ep = _round_up(E, 128)
    # Pad the contraction dim to a multiple of 128 only when cheap (<=12.5%
    # extra patch bytes), e.g. P=14, C=3 -> K=588 -> 640.  Zero padding is a
    # numerical no-op.
    Kp = _round_up(K, 128)
    if Kp != K and (Kp - K) * 8 > K:
        Kp = K

    # ---- glue: patchify + zero cls row.  (B,C,H,W) -> (B, T, Kp) bf16 ----
    patches = (
        x.reshape(B, C, nH, P, nW, P)
        .transpose(0, 2, 4, 1, 3, 5)
        .reshape(B, N, K)
        .astype(jnp.bfloat16)
    )
    patches = jnp.pad(patches, ((0, 0), (1, 0), (0, Kp - K)))   # cls row = zeros

    w_flat = conv_w.reshape(E, K).T.astype(jnp.bfloat16)         # (K, E) bf16
    # Fused additive table: row 0 = cls + pos[0] (NO conv bias there),
    # rows 1..N = pos[1:] + conv bias.  Zero cls patch row @ w == 0, so the
    # kernel's single `y + pos` produces the exact module output incl. token 0.
    pos_full = jnp.concatenate(
        [(cls_token[0, 0] + pos_embed[0])[None, :],
         pos_embed[1:] + conv_b[None, :]],
        axis=0,
    ).astype(jnp.float32)                                        # (T, E)
    if Kp != K:
        w_flat = jnp.pad(w_flat, ((0, Kp - K), (0, 0)))
    if Ep != E:
        w_flat = jnp.pad(w_flat, ((0, 0), (0, Ep - E)))
        pos_full = jnp.pad(pos_full, ((0, 0), (0, Ep - E)))

    # ---- token-tile size from the per-generation VMEM capacity ----
    try:
        vmem_cap = int(pltpu.get_tpu_info().vmem_capacity_bytes)
    except Exception:  # conservative fallback: v7x per-TensorCore VMEM
        vmem_cap = 64 * 1024 * 1024
    budget = int(0.70 * vmem_cap)          # ~90 MiB on 128 MiB parts, ~45 MiB on v7x
    limit_cap = int(0.85 * vmem_cap)       # scoped-limit headroom (never the physical max)

    w_bytes = 2 * (Kp * Ep * 2)                                  # weight, 2 bufs, bf16
    per_tok = 2 * (Kp * 2) + 2 * (Ep * 4) + 2 * (Ep * 4)         # x + pos + out, 2 bufs
    if tn is None:
        # If the weight alone overflows the budget this floors at 16 (slow but
        # legal); vmem_limit below still covers the actual working set.
        tn = (budget - w_bytes) // per_tok
        tn = max(16, min(1024, tn))
    tn = int(min(tn, T))
    if tn < T:
        # bf16 LHS native tile is (16, 128): keep tn a multiple of 16, and of
        # 128 when large so MXU passes are full.
        q = 128 if tn >= 256 else 16
        tn = max(16, (tn // q) * q)
    if B == 1 and tn >= T and T > 16:
        tn = _round_up((T + 1) // 2, 16)   # >=2 grid steps so both v7x TCs run
    n_tiles = pl.cdiv(T, tn)

    usage = w_bytes + tn * per_tok
    vmem_limit = int(min(max(int(1.3 * usage), 16 * 1024 * 1024), limit_cap))

    # ---- Pallas kernel: projection + fused cls/pos/bias add ----
    # Grid order (token tiles, batch): batch is the innermost axis, so the pos
    # block index (j, 0) and the weight block index (0, 0) are unchanged across
    # consecutive steps -> no re-DMA of pos per batch element.
    # TODO(synk): pipeline_mode=pl.Buffered(1) on the weight spec would return
    # its redundant second VMEM buffer; left at the default for safety.
    out_padded = pl.pallas_call(
        patch_embed_kernel,
        out_shape=jax.ShapeDtypeStruct((B, T, Ep), jnp.float32),
        grid_spec=pltpu.PrefetchScalarGridSpec(
            num_scalar_prefetch=0,
            grid=(n_tiles, B),
            in_specs=[
                pl.BlockSpec((1, tn, Kp), lambda j, b: (b, j, 0)),   # per-tile patches
                pl.BlockSpec((Kp, Ep), lambda j, b: (0, 0)),         # resident weight
                pl.BlockSpec((tn, Ep), lambda j, b: (j, 0)),         # resident across b
            ],
            out_specs=pl.BlockSpec((1, tn, Ep), lambda j, b: (b, j, 0)),
        ),
        compiler_params=pltpu.CompilerParams(
            dimension_semantics=("parallel", "parallel"),
            vmem_limit_bytes=vmem_limit,
        ),
    )(patches, w_flat, pos_full)

    # Only toy embedding sizes (E % 128 != 0) pay this slice.
    return out_padded[..., :E] if Ep != E else out_padded


if __name__ == "__main__":
    # Small shapes consistent with the module: in_channels=4, patch_size=4,
    # emb_size=32, img_size=32  ->  N = (32/4)^2 = 64 patches, K = 4*4*4 = 64.
    B, C, H, W = 2, 4, 32, 32
    P = 4
    E = 32
    N = (H // P) * (W // P)

    key = jax.random.PRNGKey(0)
    k_x, k_w, k_b, k_cls, k_pos = jax.random.split(key, 5)

    x = jax.random.normal(k_x, (B, C, H, W), dtype=jnp.float32)
    conv_w = jax.random.normal(k_w, (E, C, P, P), dtype=jnp.float32) * 0.02
    conv_b = jax.random.normal(k_b, (E,), dtype=jnp.float32) * 0.02
    cls_token = jax.random.normal(k_cls, (1, 1, E), dtype=jnp.float32)
    pos_embed = jax.random.normal(k_pos, (N + 1, E), dtype=jnp.float32)

    # Default tn (single full-extent tile here) and tn=16 (multi-tile grid
    # (5, 2) with a masked final tile) both exercise the kernel.
    out_default = patch_embedding_forward(x, conv_w, conv_b, cls_token, pos_embed, P)
    out_tiled = patch_embedding_forward(x, conv_w, conv_b, cls_token, pos_embed, P, tn=16)
    out_default, out_tiled = jax.block_until_ready((out_default, out_tiled))
    assert out_default.shape == (B, N + 1, E)
    assert out_tiled.shape == (B, N + 1, E)

    # Reference with the same bf16 rounding on the matmul operands (f32 accumulation).
    patches_ref = (
        x.reshape(B, C, H // P, P, W // P, P)
        .transpose(0, 2, 4, 1, 3, 5)
        .reshape(B, N, C * P * P)
    )
    p_bf = patches_ref.astype(jnp.bfloat16).astype(jnp.float32)
    w_bf = conv_w.reshape(E, -1).T.astype(jnp.bfloat16).astype(jnp.float32)
    proj_ref = p_bf @ w_bf + conv_b[None, None, :]
    cls_ref = jnp.broadcast_to(cls_token, (B, 1, E))
    ref = jnp.concatenate([cls_ref, proj_ref], axis=1) + pos_embed[None, :, :]
    assert jnp.allclose(out_default, ref, atol=1e-3, rtol=1e-3)
    assert jnp.allclose(out_tiled, ref, atol=1e-3, rtol=1e-3)

    # Loose sanity check against full-f32 math (documents the bf16-operand
    # deviation from PyTorch's f32 Conv2d; accumulation is still f32).
    proj_f32 = patches_ref @ conv_w.reshape(E, -1).T + conv_b[None, None, :]
    ref_f32 = jnp.concatenate([cls_ref, proj_f32], axis=1) + pos_embed[None, :, :]
    assert jnp.allclose(out_tiled, ref_f32, atol=5e-2, rtol=5e-2)

    print("KERNEL_OK")
</pallas_src>

<mosaic_0001>
module attributes {stable_mosaic.version = 11 : i64} {
  func.func @patch_embed_kernel(%arg0: i32, %arg1: i32, %arg2: memref<1x65x64xbf16, #tpu.memory_space<vmem>>, %arg3: memref<64x128xbf16, #tpu.memory_space<vmem>>, %arg4: memref<65x128xf32, #tpu.memory_space<vmem>>, %arg5: memref<1x65x128xf32, #tpu.memory_space<vmem>>) attributes {dimension_semantics = [#tpu.dimension_semantics<parallel>, #tpu.dimension_semantics<parallel>], iteration_bounds = array<i64: 1, 2>, scalar_prefetch = 0 : i64, scratch_operands = 0 : i64, tpu.core_type = #tpu.core_type<tc>, window_params = [{transform_indices = @transform_0, window_bounds = array<i64: 1, 65, 64>}, {pipeline_mode = #tpu.pipeline_mode<synchronous>, transform_indices = @transform_1, window_bounds = array<i64: 64, 128>}, {transform_indices = @transform_2, window_bounds = array<i64: 65, 128>}, {transform_indices = @transform_3, window_bounds = array<i64: 1, 65, 128>}]} {
    %c0 = arith.constant 0 : index
    %c0_0 = arith.constant 0 : index
    %c0_1 = arith.constant 0 : index
    %0 = vector.load %arg2[%c0, %c0_0, %c0_1] : memref<1x65x64xbf16, #tpu.memory_space<vmem>>, vector<1x65x64xbf16>
    %1 = vector.shape_cast %0 : vector<1x65x64xbf16> to vector<65x64xbf16>
    %c0_2 = arith.constant 0 : index
    %c0_3 = arith.constant 0 : index
    %2 = vector.load %arg3[%c0_2, %c0_3] : memref<64x128xbf16, #tpu.memory_space<vmem>>, vector<64x128xbf16>
    %cst = arith.constant dense<0.000000e+00> : vector<65x128xf32>
    %3 = tpu.matmul %1, %2, %cst {dimension_numbers = #tpu.dot_dimension_numbers<[1], [0], [0], [1], [0, 0, 1, 1], [], []>} : vector<65x64xbf16>, vector<64x128xbf16>, vector<65x128xf32> -> vector<65x128xf32>
    %c0_4 = arith.constant 0 : index
    %c0_5 = arith.constant 0 : index
    %4 = vector.load %arg4[%c0_4, %c0_5] : memref<65x128xf32, #tpu.memory_space<vmem>>, vector<65x128xf32>
    %5 = arith.addf %3, %4 : vector<65x128xf32>
    %c0_6 = arith.constant 0 : index
    %c0_7 = arith.constant 0 : index
    %c0_8 = arith.constant 0 : index
    %6 = vector.load %arg5[%c0_6, %c0_7, %c0_8] : memref<1x65x128xf32, #tpu.memory_space<vmem>>, vector<1x65x128xf32>
    %7 = vector.shape_cast %6 : vector<1x65x128xf32> to vector<65x128xf32>
    %8 = vector.shape_cast %5 : vector<65x128xf32> to vector<1x65x128xf32>
    tpu.vector_store %arg5[%c0_6, %c0_7, %c0_8], %8 {strides = array<i32>} : memref<1x65x128xf32, #tpu.memory_space<vmem>>, vector<1x65x128xf32>,
    return
  }
  func.func @transform_0(%arg0: i32, %arg1: i32) -> (i32, i32, i32) {
    %c0_i32 = arith.constant 0 : i32
    %c0_i32_0 = arith.constant 0 : i32
    return %arg1, %arg0, %c0_i32 : i32, i32, i32
  }
  func.func @transform_1(%arg0: i32, %arg1: i32) -> (i32, i32) {
    %c0_i32 = arith.constant 0 : i32
    %c0_i32_0 = arith.constant 0 : i32
    %c0_i32_1 = arith.constant 0 : i32
    return %c0_i32, %c0_i32_0 : i32, i32
  }
  func.func @transform_2(%arg0: i32, %arg1: i32) -> (i32, i32) {
    %c0_i32 = arith.constant 0 : i32
    %c0_i32_0 = arith.constant 0 : i32
    return %arg0, %c0_i32 : i32, i32
  }
  func.func @transform_3(%arg0: i32, %arg1: i32) -> (i32, i32, i32) {
    %c0_i32 = arith.constant 0 : i32
    %c0_i32_0 = arith.constant 0 : i32
    return %arg1, %arg0, %c0_i32 : i32, i32, i32
  }
}

</mosaic_0001>

<bundles_post_ra>
// kernel: tpu_custom_call.1
= control target key start
LH: loop header
LB: loop body
LE: loop exit
PB: predicated region body
PF: predicated region fallthrough
CT: control target
= control target key end

     0   :  { %s657_s12 = smov 0   ;;  %s659_s13 = smov 0   ;;  %s749_s0 = inlined_call_operand.vmem [shape: bf16[2,65,64], index: 0, kind: input, shape index: {}]   ;;  %s750_s1 = inlined_call_operand.vmem [shape: bf16[64,128], index: 1, kind: input, shape index: {}]   ;;  %s751_s2 = inlined_call_operand.vmem [shape: f32[65,128], index: 2, kind: input, shape index: {}]   ;;  %s752_s3 = inlined_call_operand.vmem [shape: f32[2,65,128], index: 3, kind: output, shape index: {}]  }
   0x1   :  { %s661_s14 = smov 0  }
   0x2 LB: > { %s22_s15 = sadd.s32 1, %s629_s13  ;;  %p510_p0 = scmp.ge.s32.totalorder %s633_s14, 1  ;;  %s633_s14 = sphi %s661_s14, %s13_s14   ;;  %s629_s13 = sphi %s659_s13, %s754_s13   ;;  %s625_s12 = sphi %s657_s12, %s753_s12  }
   0x3   : > { %p23_p1 = scmp.ge.s32.totalorder %s22_s15, 2  ;;  %p169_p2 = scmp.lt.s32.totalorder %s633_s14, 3 }
   0x5   : > { %s756_s15 = smov (%p23_p1, %s22_s15), 0  ;;  %p170_p3 = pnand %p510_p0, %p169_p2 }
   0x6   : > { %v602_v0 = vld [vmem:[%s750_s1] sm:$0xff] (!%p170_p3)   ;;  %v635_v1 = vmov (!%p170_p3), 0.0   ;;  %v603_v2 = vld [vmem:[%s750_s1 + $0x8] sm:$0xff] (!%p170_p3)   ;;  %p207_p4 = scmp.lt.s32.totalorder (!%p170_p3), %s625_s12, 1  ;;  %vm636_vm0 = vmmov (!%p170_p3), 0   ;;  %v604_v3 = vld [vmem:[%s750_s1 + $0x10] sm:$0xff] (!%p170_p3)  }
   0x7   : > { %173 = sbr.rel (%p170_p3) target bundleno = 256 (0x100), region = 32  ;;  %538 = vmatprep.subr.bf16.mxu0 (!%p170_p3), %v635_v1  ;;  %566 = vmatprep.subr.bf16.mxu1 (!%p170_p3), %v635_v1  ;;  %v605_v4 = vld [vmem:[%s750_s1 + $0x18] sm:$0xff] (!%p170_p3)   ;;  %vm306_vm1 = vcmask (!%p170_p3), 523264   ;;  %v250_v10 = vld [vmem:[%s751_s2] sm:$0xff] (!%p170_p3)  ;;  %v256_v11 = vld [vmem:[%s751_s2 + $0x30] sm:$0xff] (!%p170_p3) }
   0x8   : > { %539 = vmatpush3.bf16.msra.mxu0 (!%p170_p3), %v602_v0  ;;  %570 = vmatpush3.bf16.msra.mxu1 (!%p170_p3), %v602_v0  ;;  %v251_v13 = vld [vmem:[%s751_s2 + $0x8] sm:$0xff] (!%p170_p3)  ;;  %v257_v15 = vld [vmem:[%s751_s2 + $0x38] sm:$0xff] (!%p170_p3)  ;;  %v252_v26 = vld [vmem:[%s751_s2 + $0x10] sm:$0xff] (!%p170_p3) }
   0x9   : > { %540 = vmatprep.subr.bf16.mxu0 (!%p170_p3), %v635_v1  ;;  %567 = vmatprep.subr.bf16.mxu1 (!%p170_p3), %v635_v1  ;;  %v258_v27 = vld [vmem:[%s751_s2 + $0x40] sm:$0x1] (!%p170_p3)  ;;  %v253_v29 = vld [vmem:[%s751_s2 + $0x18] sm:$0xff] (!%p170_p3)  ;;  %v255_v42 = vld [vmem:[%s751_s2 + $0x28] sm:$0xff] (!%p170_p3) }
   0xa   : > { %546 = vmatprep.mubr.msk.bf16.mxu0 (!%p170_p3), %vm636_vm0, %v635_v1  ;;  %558 = vmatprep.mubr.msk.bf16.mxu1 (!%p170_p3), %vm636_vm0, %v635_v1  ;;  %v254_v40 = vld [vmem:[%s751_s2 + $0x20] sm:$0xff] (!%p170_p3) }
   0xc   : > { %541 = vmatpush3.bf16.msra.mxu0 (!%p170_p3), %v603_v2  ;;  %571 = vmatpush3.bf16.msra.mxu1 (!%p170_p3), %v603_v2 }
   0xd   : > { %542 = vmatprep.subr.bf16.mxu0 (!%p170_p3), %v635_v1  ;;  %568 = vmatprep.subr.bf16.mxu1 (!%p170_p3), %v635_v1 }
   0xe   : > { %s758_s12 = smov (!%p207_p4, %s625_s12), 1 }
   0xf   : > { %s574_s22 = smul.u32 36, %s758_s12 }
  0x10   : > { %543 = vmatpush3.bf16.msra.mxu0 %v604_v3  ;;  %572 = vmatpush3.bf16.msra.mxu1 %v604_v3  ;;  %s575_s28 = smul.u32 72, %s758_s12 }
  0x11   : > { %s214_s25 = scalar_lea.vmem %s749_s0, %s574_s22  ;;  %544 = vmatprep.subr.bf16.mxu0 %v635_v1  ;;  %569 = vmatprep.subr.bf16.mxu1 %v635_v1 }
  0x12   : > { %v606_v5 = vld [vmem:[%s214_s25] sm:$0xff]   ;;  %v607_v6 = vld [vmem:[%s214_s25 + $0x18] sm:$0xff]   ;;  %v608_v7 = vld [vmem:[%s214_s25 + $0x8] sm:$0xff]   ;;  %s708_s8 = scalar_lea.vmem %s752_s3, %s575_s28 }
  0x13   : > { %v609_v8 = vld [vmem:[%s214_s25 + $0x20] ss:$0 sps:$4 sm:$0x11]   ;;  %v610_v9 = vld [vmem:[%s214_s25 + $0x10] sm:$0xff]  }
  0x14   : > { %545 = vmatpush3.bf16.msra.mxu0 %v605_v4  ;;  %573 = vmatpush3.bf16.msra.mxu1 %v605_v4 }
  0x17   : > { %547 = vmatmul.mubr.msk.bf16.vlgmr.msra.gmra.mrb[0].mxu0 %vm306_vm1, %v606_v5  ;;  %559 = vmatmul.mubr.msk.bf16.vlgmr.msra.gmra.mrb[0].mxu1 %vm306_vm1, %v607_v6 }
  0x18   : > { %550 = vmatprep.mubr.msk.bf16.mxu0 %vm636_vm0, %v635_v1  ;;  %562 = vmatprep.mubr.msk.bf16.mxu1 %vm636_vm0, %v635_v1 }
  0x1f   : > { %551 = vmatmul.mubr.msk.bf16.gmra.mrb[4].mxu0 %vm306_vm1, %v608_v7  ;;  %563 = vmatmul.mubr.msk.bf16.gmra.mrb[4].mxu1 %vm306_vm1, %v609_v8 }
  0x20   : > { %554 = vmatprep.mubr.msk.bf16.mxu0 %vm636_vm0, %v635_v1 }
  0x27   : > { %555 = vmatmul.mubr.msk.bf16.gmra.mrb[8].mxu0 %vm306_vm1, %v610_v9 }
  0xea   : > { %v356_v12 = vpop.f32.mrb[0].mxu0  ;;  %v380_v14 = vpop.f32.mrb[0].mxu1 }
  0xeb   : > { %v357_v16 = vadd.f32 %v356_v12, %v250_v10  ;;  %v548_v17 = vpop.f32.mrb[1].mxu0  ;;  %v381_v18 = vadd.f32 %v380_v14, %v256_v11  ;;  %v560_v19 = vpop.f32.mrb[1].mxu1 }
  0xec   : > { %v359_v20 = vpop.f32.mrb[2].mxu0  ;;  %v383_v21 = vpop.f32.mrb[2].mxu1 }
  0xed   : > { %394 = vst [vmem:[%s708_s8] sm:$0xff] %v357_v16  ;;  %v360_v22 = vadd.f32 %v359_v20, %v251_v13  ;;  %v549_v23 = vpop.f32.mrb[3].mxu0  ;;  %400 = vst [vmem:[%s708_s8 + $0x30] sm:$0xff] %v381_v18  ;;  %v384_v24 = vadd.f32 %v383_v21, %v257_v15  ;;  %v561_v25 = vpop.f32.mrb[3].mxu1 }
  0xef   : > { %395 = vst [vmem:[%s708_s8 + $0x8] sm:$0xff] %v360_v22  ;;  %401 = vst [vmem:[%s708_s8 + $0x38] sm:$0xff] %v384_v24 }
  0xf2   : > { %v364_v28 = vpop.f32.mrb[4].mxu0  ;;  %v388_v30 = vpop.f32.mrb[4].mxu1 }
  0xf3   : > { %v365_v31 = vadd.f32 %v364_v28, %v252_v26  ;;  %v552_v32 = vpop.f32.mrb[5].mxu0  ;;  %v389_v33 = vadd.f32 %v388_v30, %v258_v27  ;;  %v564_v34 = vpop.f32.mrb[5].mxu1 }
  0xf4   : > { %v367_v35 = vpop.f32.mrb[6].mxu0  ;;  %v391_v36 = vpop.f32.mrb[6].mxu1 }
  0xf5   : > { %396 = vst [vmem:[%s708_s8 + $0x10] sm:$0xff] %v365_v31  ;;  %v368_v37 = vadd.f32 %v367_v35, %v253_v29  ;;  %v553_v38 = vpop.f32.mrb[7].mxu0  ;;  %402 = vst [vmem:[%s708_s8 + $0x40] sm:$0x1] %v389_v33  ;;  %v565_v39 = vpop.f32.mrb[7].mxu1 }
  0xf7   : > { %397 = vst [vmem:[%s708_s8 + $0x18] sm:$0xff] %v368_v37 }
  0xfa   : > { %v372_v41 = vpop.f32.mrb[8].mxu0 }
  0xfb   : > { %v373_v43 = vadd.f32 %v372_v41, %v254_v40  ;;  %v556_v44 = vpop.f32.mrb[9].mxu0 }
  0xfc   : > { %v375_v45 = vpop.f32.mrb[10].mxu0 }
  0xfd   : > { %398 = vst [vmem:[%s708_s8 + $0x20] sm:$0xff] %v373_v43  ;;  %v376_v46 = vadd.f32 %v375_v45, %v255_v42  ;;  %v557_v47 = vpop.f32.mrb[11].mxu0 }
  0xff   : > { %399 = vst [vmem:[%s708_s8 + $0x28] sm:$0xff] %v376_v46 }
 0x100 PF: > { %s13_s14 = sadd.s32 1, %s633_s14   ;;  %s753_s12 = smov %s629_s13 }
 0x101   : > { %p10_p5 = scmp.ge.s32.totalorder %s13_s14, 4   ;;  %s754_s13 = smov %s756_s15 }
 0x103   :  { %12 = sbr.rel (!%p10_p5) target bundleno = 2 (0x2), region = 65 }

</bundles_post_ra>
